<compile_context>
chip_gen: v6e
topology: v6e:2x2x1
jax: 0.10.0
libtpu: 0.0.40
codegen_flags: <defaults>
</compile_context>

<pallas_src>
import functools

import jax
import jax.numpy as jnp
from jax.experimental import pallas as pl
from jax.experimental.pallas import tpu as pltpu

_LANES = 128
_SUBLANES = 8
_TILE = _SUBLANES * _LANES            # 1024 elements = one f32 vreg
_MAX_BLOCK_ROWS = 4096                # (4096, 128) f32 = 2 MiB per input block
_VMEM_LIMIT = 32 * 1024 * 1024        # safe on v5e/v6e/v7x, headroom for temps


def _newton_recip(v):
    """EUP approximate reciprocal + one Newton step (keeps 5e-5 tolerance)."""
    r = pl.reciprocal(v, approx=True)
    return r * (2.0 - v * r)


def _focal_loss_elements(x, t, alpha, gamma, recip=lambda v: 1.0 / v):
    """Numerically stable elementwise sigmoid focal loss, minimal VALU/EUP work."""
    e = jnp.exp(-jnp.abs(x))                          # shared: BCE log-term + sigmoid
    ce = jnp.maximum(x, 0.0) - x * t + jnp.log1p(e)   # BCE with logits
    r = recip(1.0 + e)
    p = jnp.where(x >= 0.0, r, e * r)                 # == sigmoid(x)
    # u = 1 - p_t with p_t = p*t + (1-p)*(1-t)  ==>  u = p + t - 2*p*t
    u = p + t - 2.0 * (p * t)
    if float(gamma) == int(gamma) and gamma >= 0:     # integer gamma -> repeated mult
        g = int(gamma)
        if g == 0:
            mod = jnp.ones_like(u)
        else:
            mod = None
            base = u
            while g:
                if g & 1:
                    mod = base if mod is None else mod * base
                g >>= 1
                if g:
                    base = base * base
    else:
        mod = u ** gamma
    loss = ce * mod
    if alpha >= 0:
        # alpha_t = alpha*t + (1-alpha)*(1-t) = (1-alpha) + (2*alpha-1)*t
        loss = ((1.0 - alpha) + (2.0 * alpha - 1.0) * t) * loss
    return loss


def _focal_loss_kernel(x_ref, t_ref, out_ref, *, alpha, gamma, block_rows,
                       valid_rows_last):
    x = x_ref[...].astype(jnp.float32)
    t = t_ref[...].astype(jnp.float32)

    loss = _focal_loss_elements(x, t, alpha, gamma, recip=_newton_recip)

    def _partial(v):
        # (block_rows,128) -> (8,128) lane-parallel partial: pure VALU vreg adds
        # (the reshape keeps (8,128) tiles intact); the single cross-lane
        # reduction is paid once, in the wrapper.
        return v.reshape(block_rows // _SUBLANES, _SUBLANES, _LANES).sum(axis=0)

    # Unmasked partial for every block (the common case pays zero mask cost).
    out_ref[...] = _partial(loss)

    if valid_rows_last != block_rows:
        # Only the final grid block can be partial; the masked re-reduce is
        # emitted statically only when needed and skipped at runtime elsewhere.
        @pl.when(pl.program_id(0) == pl.num_programs(0) - 1)
        def _():
            row_ids = jax.lax.broadcasted_iota(jnp.int32, (block_rows, _LANES), 0)
            # Keep jnp.where (a select): the out-of-bounds rows hold garbage
            # that may be Inf/NaN; a multiply-by-mask would leak NaN.
            out_ref[...] = _partial(
                jnp.where(row_ids < valid_rows_last, loss, 0.0))


def focal_loss(inputs, targets, alpha=0.25, gamma=2.0, size_average=True):
    """Pallas equivalent of FocalLoss.forward (torchvision sigmoid_focal_loss)."""
    n = inputs.size
    x = inputs.reshape(-1)
    t = targets.reshape(-1)
    if not jnp.issubdtype(t.dtype, jnp.floating):
        # targets.float() in PyTorch; bf16 is exact for 0/1 (and small-int)
        # labels and halves target HBM traffic vs an f32 upcast. Floating
        # targets keep their dtype (no host-side upcast) and are cast in-kernel.
        t = t.astype(jnp.bfloat16)

    total = jnp.float32(0.0)

    tail = n % _LANES               # only the sub-lane remainder (<128) left to JAX
    main = n - tail
    jax_start = 0

    if main >= _TILE:               # at least one full (8,128) vreg -> kernel path
        rows = main // _LANES
        # When tail == 0 these reshapes are free bitcasts (no HBM copy).
        xm = (x if tail == 0 else x[:main]).reshape(rows, _LANES)
        tm = (t if tail == 0 else t[:main]).reshape(rows, _LANES)

        # Cap block_rows at ~rows/2 (rounded up to a multiple of 8) so the grid
        # has >= 2 blocks for mid-sized inputs (keeps both v7x TCs busy), and at
        # _MAX_BLOCK_ROWS for VMEM.
        half8 = (((rows + 1) // 2 + _SUBLANES - 1) // _SUBLANES) * _SUBLANES
        block_rows = max(_SUBLANES, min(_MAX_BLOCK_ROWS, half8))
        num_blocks = (rows + block_rows - 1) // block_rows
        valid_rows_last = rows - (num_blocks - 1) * block_rows

        kernel = functools.partial(
            _focal_loss_kernel, alpha=float(alpha), gamma=float(gamma),
            block_rows=block_rows, valid_rows_last=valid_rows_last)

        partials = pl.pallas_call(
            kernel,
            out_shape=jax.ShapeDtypeStruct((num_blocks * _SUBLANES, _LANES),
                                           jnp.float32),
            grid_spec=pltpu.PrefetchScalarGridSpec(
                num_scalar_prefetch=0,
                grid=(num_blocks,),
                in_specs=[pl.BlockSpec((block_rows, _LANES), lambda i: (i, 0)),
                          pl.BlockSpec((block_rows, _LANES), lambda i: (i, 0))],
                out_specs=pl.BlockSpec((_SUBLANES, _LANES), lambda i: (i, 0)),
            ),
            compiler_params=pltpu.CompilerParams(
                dimension_semantics=("parallel",),      # independent partials
                vmem_limit_bytes=_VMEM_LIMIT),
        )(xm, tm)
        total = total + jnp.sum(partials, dtype=jnp.float32)
        jax_start = main

    if jax_start < n:
        # Tiny remainder (< 128 elems when the kernel ran): plain JAX. Note the
        # prefix slice above may materialize a copy only in this (rare,
        # non-lane-aligned) case; lane-aligned inputs take the zero-copy path.
        xt = x[jax_start:].astype(jnp.float32)
        tt = t[jax_start:].astype(jnp.float32)
        total = total + jnp.sum(_focal_loss_elements(xt, tt, alpha, gamma))

    if size_average:
        return total / jnp.float32(n)
    return total


def _reference_focal_loss(inputs, targets, alpha=0.25, gamma=2.0, size_average=True):
    """Pure-JAX reference matching torchvision sigmoid_focal_loss."""
    x = inputs.astype(jnp.float32)
    t = targets.astype(jnp.float32)
    p = jax.nn.sigmoid(x)
    ce = jnp.maximum(x, 0.0) - x * t + jnp.log1p(jnp.exp(-jnp.abs(x)))
    p_t = p * t + (1.0 - p) * (1.0 - t)
    loss = ce * (1.0 - p_t) ** gamma
    if alpha >= 0:
        alpha_t = alpha * t + (1.0 - alpha) * (1.0 - t)
        loss = alpha_t * loss
    return loss.mean() if size_average else loss.sum()


if __name__ == "__main__":
    key = jax.random.PRNGKey(0)

    # Primary: NCHW conv-head logits as the PyTorch module would see.
    # Extra shapes exercise the lane-aligned zero-copy path, the sub-lane tail
    # path, and the masked (pl.when-gated) partial last block.
    shapes = [
        (2, 4, 16, 16),     # 2048 elems: even grid, no mask, no tail
        (2, 3, 33, 21),     # 4158 elems: lane-unaligned -> small JAX tail
        (2, 4, 136, 136),   # 147968 elems: lane-aligned, masked last block
    ]

    for idx, shp in enumerate(shapes):
        k1, k2 = jax.random.split(jax.random.fold_in(key, idx))
        inputs = jax.random.normal(k1, shp, dtype=jnp.float32) * 2.0
        targets = (jax.random.uniform(k2, shp) > 0.5).astype(jnp.float32)

        out = focal_loss(inputs, targets, alpha=0.25, gamma=2.0, size_average=True)
        out = jax.block_until_ready(out)
        ref = _reference_focal_loss(inputs, targets)
        assert jnp.allclose(out, ref, rtol=5e-5, atol=1e-6), (shp, out, ref)

    print("KERNEL_OK")
</pallas_src>

<mosaic_0001>
module attributes {stable_mosaic.version = 11 : i64} {
  func.func @_focal_loss_kernel(%arg0: i32, %arg1: memref<8x128xf32, #tpu.memory_space<vmem>>, %arg2: memref<8x128xf32, #tpu.memory_space<vmem>>, %arg3: memref<8x128xf32, #tpu.memory_space<vmem>>) attributes {dimension_semantics = [#tpu.dimension_semantics<parallel>], iteration_bounds = array<i64: 2>, scalar_prefetch = 0 : i64, scratch_operands = 0 : i64, tpu.core_type = #tpu.core_type<tc>, window_params = [{transform_indices = @transform_0, window_bounds = array<i64: 8, 128>}, {transform_indices = @transform_1, window_bounds = array<i64: 8, 128>}, {transform_indices = @transform_2, window_bounds = array<i64: 8, 128>}]} {
    %c0 = arith.constant 0 : index
    %c0_0 = arith.constant 0 : index
    %0 = vector.load %arg1[%c0, %c0_0] : memref<8x128xf32, #tpu.memory_space<vmem>>, vector<8x128xf32>
    %c0_1 = arith.constant 0 : index
    %c0_2 = arith.constant 0 : index
    %1 = vector.load %arg2[%c0_1, %c0_2] : memref<8x128xf32, #tpu.memory_space<vmem>>, vector<8x128xf32>
    %2 = math.absf %0 : vector<8x128xf32>
    %cst = arith.constant 0.000000e+00 : f32
    %3 = vector.broadcast %cst : f32 to vector<8x128xf32>
    %4 = arith.subf %3, %2 : vector<8x128xf32>
    %5 = math.exp %4 : vector<8x128xf32>
    %cst_3 = arith.constant 0.000000e+00 : f32
    %6 = vector.broadcast %cst_3 : f32 to vector<8x128xf32>
    %7 = arith.maximumf %0, %6 : vector<8x128xf32>
    %8 = arith.mulf %0, %1 : vector<8x128xf32>
    %9 = arith.subf %7, %8 : vector<8x128xf32>
    %10 = math.log1p %5 : vector<8x128xf32>
    %11 = arith.addf %9, %10 : vector<8x128xf32>
    %cst_4 = arith.constant 1.000000e+00 : f32
    %12 = vector.broadcast %cst_4 : f32 to vector<8x128xf32>
    %13 = arith.addf %12, %5 : vector<8x128xf32>
    %14 = tpu.reciprocal %13 {approx = true} : vector<8x128xf32> -> vector<8x128xf32>
    %15 = arith.mulf %13, %14 : vector<8x128xf32>
    %cst_5 = arith.constant 2.000000e+00 : f32
    %16 = vector.broadcast %cst_5 : f32 to vector<8x128xf32>
    %17 = arith.subf %16, %15 : vector<8x128xf32>
    %18 = arith.mulf %14, %17 : vector<8x128xf32>
    %cst_6 = arith.constant 0.000000e+00 : f32
    %19 = vector.broadcast %cst_6 : f32 to vector<8x128xf32>
    %20 = arith.cmpf oge, %0, %19 : vector<8x128xf32>
    %21 = arith.mulf %5, %18 : vector<8x128xf32>
    %22 = arith.select %20, %18, %21 : vector<8x128xi1>, vector<8x128xf32>
    %23 = arith.addf %22, %1 : vector<8x128xf32>
    %24 = arith.mulf %22, %1 : vector<8x128xf32>
    %cst_7 = arith.constant 2.000000e+00 : f32
    %25 = vector.broadcast %cst_7 : f32 to vector<8x128xf32>
    %26 = arith.mulf %25, %24 : vector<8x128xf32>
    %27 = arith.subf %23, %26 : vector<8x128xf32>
    %28 = arith.mulf %27, %27 : vector<8x128xf32>
    %29 = arith.mulf %11, %28 : vector<8x128xf32>
    %cst_8 = arith.constant -5.000000e-01 : f32
    %30 = vector.broadcast %cst_8 : f32 to vector<8x128xf32>
    %31 = arith.mulf %30, %1 : vector<8x128xf32>
    %cst_9 = arith.constant 7.500000e-01 : f32
    %32 = vector.broadcast %cst_9 : f32 to vector<8x128xf32>
    %33 = arith.addf %32, %31 : vector<8x128xf32>
    %34 = arith.mulf %33, %29 : vector<8x128xf32>
    %35 = vector.shape_cast %34 : vector<8x128xf32> to vector<1x8x128xf32>
    %cst_10 = arith.constant dense<0.000000e+00> : vector<8x128xf32>
    %36 = vector.multi_reduction <add>, %35, %cst_10 [0] : vector<1x8x128xf32> to vector<8x128xf32>
    %c0_11 = arith.constant 0 : index
    %c0_12 = arith.constant 0 : index
    %37 = vector.load %arg3[%c0_11, %c0_12] : memref<8x128xf32, #tpu.memory_space<vmem>>, vector<8x128xf32>
    tpu.vector_store %arg3[%c0_11, %c0_12], %36 {strides = array<i32>} : memref<8x128xf32, #tpu.memory_space<vmem>>, vector<8x128xf32>,
    return
  }
  func.func @transform_0(%arg0: i32) -> (i32, i32) {
    %c0_i32 = arith.constant 0 : i32
    %c0_i32_0 = arith.constant 0 : i32
    return %arg0, %c0_i32 : i32, i32
  }
  func.func @transform_1(%arg0: i32) -> (i32, i32) {
    %c0_i32 = arith.constant 0 : i32
    %c0_i32_0 = arith.constant 0 : i32
    return %arg0, %c0_i32 : i32, i32
  }
  func.func @transform_2(%arg0: i32) -> (i32, i32) {
    %c0_i32 = arith.constant 0 : i32
    %c0_i32_0 = arith.constant 0 : i32
    return %arg0, %c0_i32 : i32, i32
  }
}

</mosaic_0001>

<bundles_post_ra>
// kernel: tpu_custom_call.1
= control target key start
LH: loop header
LB: loop body
LE: loop exit
PB: predicated region body
PF: predicated region fallthrough
CT: control target
= control target key end

     0   :  { %7 = vsyncpa [#allocation3], 0  ;;  %s756_s0 = inlined_call_operand.hbm [shape: f32[16,128], index: 0, kind: input, shape index: {}]   ;;  %s757_s1 = inlined_call_operand.hbm [shape: f32[16,128], index: 1, kind: input, shape index: {}]   ;;  %s758_s2 = inlined_call_operand.hbm [shape: f32[16,128], index: 2, kind: output, shape index: {}]  }
   0x1   :  { %9 = vsyncpa [#allocation3 + $0x1], 0 }
   0x2   :  { %10 = vsyncpa [#allocation6], 0 }
   0x3   :  { %12 = vsyncpa [#allocation6 + $0x1], 0 }
   0x4   :  { %13 = vsyncpa [#allocation4], 0 }
   0x5   :  { %15 = vsyncpa [#allocation4 + $0x1], 0  ;;  %s557_s9 = smov 0   ;;  %s559_s10 = smov 0  }
   0x6   :  { %s561_s11 = smov 0   ;;  %s563_s12 = smov 0  }
   0x7 LB: > { %s578_s13 = sadd.s32 4294967295, %s537_s12   ;;  %s341_s14 = sadd.s32 4294967294, %s537_s12   ;;  %s537_s12 = sphi %s563_s12, %s777_s12   ;;  %s533_s11 = sphi %s561_s11, %s776_s11   ;;  %s529_s10 = sphi %s559_s10, %s775_s10   ;;  %s525_s9 = sphi %s557_s9, %s774_s9  }
   0x8   : > { %s582_s15 = sadd.s32 1, %s537_s12   ;;  %s28_s16 = sadd.s32 1, %s533_s11 }
   0x9   : > { %s25_s17 = ssub.s32 %s537_s12, %s582_s15  ;;  %p35_p0 = scmp.ne.s32.totalorder %s533_s11, %s529_s10 }
   0xa   : > { %p26_p1 = scmp.eq.s32.totalorder %s25_s17, 0  ;;  %p36_p2 = scmp.eq.s32.totalorder %s537_s12, 0 }
   0xb   : > { %p41_p3 = scmp.ne.s32.totalorder %s529_s10, %s525_s9  ;;  %p42_p4 = scmp.eq.s32.totalorder %s578_s13, 0 }
   0xc   : > { %s594_s18 = scalar_select %p26_p1, %s533_s11, %s28_s16  }
   0xd   : > { %p596_p5 = por %p36_p2, %p35_p0  ;;  %p600_p6 = por %p42_p4, %p41_p3 }
   0xe   : > { %p91_p7 = scmp.eq.s32.totalorder %s578_s13, 1  ;;  %p97_p8 = scmp.eq.s32.totalorder %s341_s14, 1 }
   0xf   : > { %s762_s20 = scalar_select %p600_p6, 1, 0 }
  0x10   : > { %p373_p10 = scmp.lt.s32.totalorder %s537_s12, 2  ;;  %p607_p11 = por %p91_p7, %p35_p0 }
  0x11   : > { %p611_p12 = por %p97_p8, %p41_p3  ;;  %s616_s23 = sand.u32 1, %s533_s11  }
  0x12   : > { %s763_s21 = scalar_select %p607_p11, 1, 0 }
  0x13   : > { %s764_s22 = scalar_select %p611_p12, 1, 0 }
  0x14   : > { %s345_s24 = sshll.u32 %s537_s12, 7  ;;  %s344_s25 = sshll.u32 %s616_s23, 3 }
  0x15   : > { %s625_s28 = scalar_lea.hbm %s756_s0, %s345_s24  ;;  %s121_s29 = scalar_lea.vmem [#allocation2], %s344_s25 }
  0x16   : > { %s128_s30 = sshll.u32 %s121_s29, 4  ;;  %p631_p13 = pnand %p373_p10, %p596_p5  ;;  %s635_s30 = int_to_ptr.vmem [resolvable:$true] %s128_s30 }
  0x17   : > { %s118_s4 = scalar_lea.sflag [#allocation3], %s616_s23  ;;  %s413_s5 = scalar_lea.hbm %s625_s28, 128 }
  0x18   : > { %p414_p2 = scmp.ne.s32.totalorder %s625_s28, %s413_s5  ;;  %p415_p3 = pneg %p631_p13 }
  0x19   : > { %s418_s8 = scalar_lea.hbm %s756_s0, 256  ;;  %p419_p5 = scmp.lt.s32.totalorder %s625_s28, %s756_s0 }
  0x1a   : > { %p416_p4 = pnand %p415_p3, %p414_p2  ;;  %p420_p8 = scmp.lt.s32.totalorder %s418_s8, %s413_s5 }
  0x1c   : > { %p417_p7 = pneg %p416_p4  ;;  %p421_p10 = por %p420_p8, %p419_p5 }
  0x1e   : > { %p422_p9 = pnand %p421_p10, %p417_p7 }
  0x20   : > { %425 = shalt.err (!%p422_p9)
}
  0x21   : > { %s426_s17 = scalar_lea.vmem %s635_s30, 128  ;;  %s539_s19 = smov [#allocation2]  }
  0x22   : > { %p427_p0 = scmp.ne.s32.totalorder %s635_s30, %s426_s17  ;;  %s431_s26 = sshll.u32 %s539_s19, 4  ;;  %s432_s26 = int_to_ptr.vmem [resolvable:$false] %s431_s26 }
  0x23   : > { %s433_s27 = scalar_lea.vmem %s432_s26, 256  ;;  %p434_p1 = scmp.lt.s32.totalorder %s635_s30, %s432_s26 }
  0x24   : > { %p429_p2 = pnand %p427_p0, %p415_p3  ;;  %p435_p12 = scmp.lt.s32.totalorder %s433_s27, %s426_s17 }
  0x26   : > { %p430_p4 = pneg %p429_p2  ;;  %p436_p11 = por %p435_p12, %p434_p1 }
  0x28   : > { %p437_p5 = pnand %p436_p11, %p430_p4 }
  0x2a   : > { %440 = shalt.err (!%p437_p5)
}
  0x2b   : > { %365 = dma.hbm_to_vmem [thread:$0]  (!%p631_p13), %s625_s28, 128, %s635_s30, %s118_s4  }
  0x2c   : > { %p766_p9 = scmp.lt.s32.totalorder %s537_s12, 3  ;;  %p767_p0 = scmp.ge.s32.totalorder %s537_s12, 1 }
  0x2d   : > { %s677_s7 = scalar_lea.hbm %s757_s1, %s345_s24  ;;  %s139_s8 = scalar_lea.vmem [#allocation5], %s344_s25 }
  0x2e   : > { %p668_p7 = pnand %p767_p0, %p766_p9  ;;  %s146_s14 = sshll.u32 %s139_s8, 4  ;;  %s147_s14 = int_to_ptr.vmem [resolvable:$true] %s146_s14 }
  0x2f   : > { %s136_s28 = scalar_lea.sflag [#allocation6], %s616_s23  ;;  %s441_s30 = scalar_lea.hbm %s677_s7, 128 }
  0x30   : > { %s768_s29 = scalar_select %p668_p7, 1, 0 }
  0x31   : > { %p442_p11 = scmp.ne.s32.totalorder %s677_s7, %s441_s30  ;;  %s446_s17 = scalar_lea.hbm %s757_s1, 256 }
  0x32   : > { %p447_p8 = scmp.lt.s32.totalorder %s677_s7, %s757_s1  ;;  %p448_p10 = scmp.lt.s32.totalorder %s446_s17, %s441_s30 }
  0x33   : > { %p444_p12 = pnand %p442_p11, %p415_p3 }
  0x34   : > { %p449_p2 = por %p448_p10, %p447_p8 }
  0x35   : > { %p445_p1 = pneg %p444_p12 }
  0x37   : > { %p450_p4 = pnand %p449_p2, %p445_p1 }
  0x39   : > { %453 = shalt.err (!%p450_p4)
}
  0x3a   : > { %s454_s25 = scalar_lea.vmem %s147_s14, 128  ;;  %s540_s23 = smov [#allocation5]  }
  0x3b   : > { %p455_p5 = scmp.ne.s32.totalorder %s147_s14, %s454_s25  ;;  %s459_s26 = sshll.u32 %s540_s23, 4  ;;  %s460_s26 = int_to_ptr.vmem [resolvable:$false] %s459_s26 }
  0x3c   : > { %s461_s27 = scalar_lea.vmem %s460_s26, 256  ;;  %p462_p11 = scmp.lt.s32.totalorder %s147_s14, %s460_s26 }
  0x3d   : > { %p457_p9 = pnand %p455_p5, %p415_p3  ;;  %p463_p12 = scmp.lt.s32.totalorder %s461_s27, %s454_s25 }
  0x3f   : > { %p458_p0 = pneg %p457_p9  ;;  %p464_p6 = por %p463_p12, %p462_p11 }
  0x41   : > { %p465_p7 = pnand %p464_p6, %p458_p0 }
  0x43   : > { %468 = shalt.err (!%p465_p7)
}
  0x44   : > { %368 = dma.hbm_to_vmem [thread:$0]  (!%p631_p13), %s677_s7, 128, %s147_s14, %s136_s28  }
  0x45   : > { %p769_p1 = scmp.ne.s32.totalorder %s768_s29, 0 }
  0x46   : > { %s703_s5 = sand.u32 (!%p769_p1), 1, %s529_s10   ;;  %p770_p6 = scmp.ne.s32.totalorder (!%p769_p1), %s762_s20, 0 }
  0x47   : > { %155 = sbr.rel (%p769_p1) target bundleno = 150 (0x96), region = 28  ;;  %s706_s6 = sshll.u32 (!%p769_p1), %s703_s5, 3 }
  0x48   : > { %s158_s8 = scalar_lea.sflag (!%p769_p1), [#allocation3], %s703_s5  ;;  %s161_s30 = scalar_lea.vmem (!%p769_p1), [#allocation2], %s706_s6 }
  0x4c   : > { %512 = dma.done.wait (%p770_p6), %s158_s8, 128  }
  0x4d   : > { %514 = vsyncadd (%p770_p6), %s158_s8, 4294967168  ;;  %s167_s3 = scalar_lea.sflag [#allocation6], %s703_s5  ;;  %s170_s29 = scalar_lea.vmem [#allocation5], %s706_s6 }
  0x4e   : > { %516 = dma.done.wait (%p770_p6), %s167_s3, 128  }
  0x4f   : > { %518 = vsyncadd (%p770_p6), %s167_s3, 4294967168  ;;  %v196_v0 = vld [vmem:[%s161_s30] sm:$0xff]  ;;  %v197_v13 = vld [vmem:[%s170_s29] sm:$0xff]  ;;  %s195_s20 = scalar_lea.vmem [#allocation7], %s706_s6  ;;  %s353_s14 = sshll.u32 %s578_s13, 7 }
  0x50   : > { %v198_v1 = vand.u32 2147483647, %v196_v0  ;;  %v202_v15 = vmax.f32 %v196_v0, 0.0  ;;  %v203_v16 = vmul.f32 %v197_v13, %v196_v0  ;;  %vm220_vm0 = vcmp.ge.f32.partialorder %v196_v0, 0.0  ;;  %s248_s7 = sshll.u32 %s195_s20, 4  ;;  %s246_s16 = scalar_lea.hbm %s758_s2, %s353_s14  ;;  %s249_s7 = int_to_ptr.vmem [resolvable:$true] %s248_s7 }
  0x51   : > { %v229_v26 = vmul.f32 -0.5, %v197_v13  ;;  %s235_s17 = scalar_lea.sflag [#allocation4], %s703_s5  ;;  %s469_s24 = scalar_lea.vmem %s249_s7, 128 }
  0x52   : > { %v199_v2 = vsub.f32 0.0, %v198_v1  ;;  %v204_v21 = vsub.f32 %v202_v15, %v203_v16  ;;  %p470_p13 = scmp.ne.s32.totalorder %s249_s7, %s469_s24  ;;  %p771_p3 = scmp.ne.s32.totalorder %s763_s21, 0 }
  0x53   : > { %v230_v30 = vadd.f32 0.75, %v229_v26  ;;  %s541_s19 = smov [#allocation7]  }
  0x54   : > { %v200_v3 = vmul.f32 1.442695, %v199_v2  ;;  %p471_p7 = pnand %p470_p13, %p771_p3  ;;  %s473_s25 = sshll.u32 %s541_s19, 4  ;;  %s474_s25 = int_to_ptr.vmem [resolvable:$false] %s473_s25 }
  0x55   : > { %s475_s23 = scalar_lea.vmem %s474_s25, 256  ;;  %p476_p10 = scmp.lt.s32.totalorder %s249_s7, %s474_s25 }
  0x56   : > { %407 = vpow2.f32 %v200_v3  ;;  %p472_p8 = pneg %p471_p7  ;;  %p477_p2 = scmp.lt.s32.totalorder %s475_s23, %s469_s24 }
  0x58   : > { %p478_p4 = por %p477_p2, %p476_p10 }
  0x5a   : > { %p479_p5 = pnand %p478_p4, %p472_p8 }
  0x63   : > { %v408_v4 = vpop.eup %407 }
  0x64   : > { %v205_v5 = vadd.f32 1.0, %v408_v4  ;;  %v208_v6 = vmul.f32 -0.5, %v408_v4  ;;  %v211_v12 = vand.u32 2147483647, %v408_v4 }
  0x66   : > { %409 = vrcp.f32 %v205_v5  ;;  %v209_v9 = vadd.f32 1.0, %v208_v6  ;;  %vm212_vm1 = vcmp.lt.f32.partialorder %v211_v12, 0.0004427343 }
  0x67   : > { %411 = vlog2.f32 %v205_v5 }
  0x68   : > { %v210_v18 = vmul.f32 %v408_v4, %v209_v9 }
  0x73   : > { %v410_v7 = vpop.eup %409 }
  0x74   : > { %v217_v8 = vmul.f32 %v410_v7, %v205_v5  ;;  %v412_v11 = vpop.eup %411 }
  0x75   : > { %v207_v17 = vmul.f32 0.6931472, %v412_v11 }
  0x76   : > { %v218_v10 = vsub.f32 2.0, %v217_v8 }
  0x77   : > { %v213_v24 = vsel %vm212_vm1, %v210_v18, %v207_v17 }
  0x78   : > { %v219_v14 = vmul.f32 %v410_v7, %v218_v10  ;;  %v214_v27 = vadd.f32 %v213_v24, %v204_v21 }
  0x7a   : > { %v221_v19 = vmul.f32 %v408_v4, %v219_v14 }
  0x7c   : > { %v222_v20 = vsel %vm220_vm0, %v219_v14, %v221_v19 }
  0x7d   : > { %v223_v22 = vadd.f32 %v222_v20, %v197_v13  ;;  %v224_v23 = vmul.f32 %v222_v20, %v197_v13 }
  0x7f   : > { %v225_v25 = vmul.f32 2.0, %v224_v23 }
  0x81   : > { %v226_v28 = vsub.f32 %v223_v22, %v225_v25 }
  0x83   : > { %v227_v29 = vmul.f32 %v226_v28, %v226_v28 }
  0x85   : > { %v228_v31 = vmul.f32 %v227_v29, %v214_v27 }
  0x87   : > { %v231_v32 = vmul.f32 %v230_v30, %v228_v31 }
  0x89   : > { %233 = vst [vmem:[%s195_s20] sm:$0xff] %v231_v32 }
  0x8a   : > { %482 = shalt.err (!%p479_p5)
}
  0x8b   : > { %s483_s13 = scalar_lea.hbm %s246_s16, 128  ;;  %s487_s5 = scalar_lea.hbm %s758_s2, 256 }
  0x8c   : > { %p484_p9 = scmp.ne.s32.totalorder %s246_s16, %s483_s13  ;;  %p488_p12 = scmp.lt.s32.totalorder %s246_s16, %s758_s2 }
  0x8d   : > { %p489_p1 = scmp.lt.s32.totalorder %s487_s5, %s483_s13 }
  0x8e   : > { %p485_p0 = pnand %p484_p9, %p771_p3 }
  0x8f   : > { %p490_p6 = por %p489_p1, %p488_p12 }
  0x90   : > { %p486_p11 = pneg %p485_p0 }
  0x92   : > { %p491_p13 = pnand %p490_p6, %p486_p11 }
  0x94   : > { %494 = shalt.err (!%p491_p13)
}
  0x95   : > { %360 = dma.vmem_to_hbm [thread:$0]  (%p771_p3), %s249_s7, 128, %s246_s16, %s235_s17  }
  0x96 PF: > { %s260_s30 = sand.u32 1, %s525_s9   ;;  %p772_p7 = scmp.ne.s32.totalorder %s764_s22, 0 }
  0x97   : > { %p773_p8 = scmp.ge.s32.totalorder %s537_s12, 2  ;;  %s261_s3 = scalar_lea.sflag [#allocation4], %s260_s30 }
  0x99   : > { %p370_p10 = pnand %p773_p8, %p772_p7 }
  0x9b   : > { %p371_p2 = pneg %p370_p10 }
  0x9d   : > { %520 = dma.done.wait (%p371_p2), %s261_s3, 128  }
  0x9e   : > { %522 = vsyncadd (%p371_p2), %s261_s3, 4294967168  ;;  %p18_p4 = scmp.ge.s32.totalorder %s582_s15, 4   ;;  %s774_s9 = smov %s529_s10 }
  0x9f   : > { %s775_s10 = smov %s533_s11  ;;  %s776_s11 = smov %s594_s18 }
  0xa0   : > { %s777_s12 = smov %s582_s15  ;;  %20 = sbr.rel (!%p18_p4) target bundleno = 7 (0x7), region = 86 }
  0xa5   :  { %266 = vsyncpa [#allocation3], 1 }
  0xa6   :  { %268 = vsyncpa [#allocation3 + $0x1], 1 }
  0xa7   :  { %269 = vsyncpa [#allocation6], 1 }
  0xa8   :  { %271 = vsyncpa [#allocation6 + $0x1], 1 }
  0xa9   :  { %272 = vsyncpa [#allocation4], 1 }
  0xaa   :  { %274 = vsyncpa [#allocation4 + $0x1], 1 }

</bundles_post_ra>
